<compile_context>
chip_gen: v7x
topology: tpu7x:2x2x1
jax: 0.10.0
libtpu: 0.0.40
codegen_flags: <defaults>
</compile_context>

<pallas_src>
import jax
import jax.numpy as jnp
from jax.experimental import pallas as pl
from jax.experimental.pallas import tpu as pltpu

BN_EPS = 1e-5
LANE = 128
CHUNK_LANES = 256          # in-kernel batch sub-chunk (lane axis)


def _round_up(n, m):
    return (n + m - 1) // m * m


# ---------------------------------------------------------------------------
# Kernel (feature-major: features on sublanes, batch on lanes)
#   x_ref   : (IN_PAD, TILE_B)   bf16
#   w_i/b_i : (OUT_PAD, IN_PAD) bf16 / (OUT_PAD, 1) f32   (BN-eval folded in)
#   wmu/bmu : (LAT_PAD, H_PAD)  bf16 / (LAT_PAD, 1) f32
#   mu_ref  : (LAT_PAD, TILE_B)  f32   (lane-dense, tiny)
# ---------------------------------------------------------------------------
def _make_encoder_kernel(n_hidden, chunk, n_chunks):
    def kernel(*refs):
        x_ref = refs[0]
        hidden_refs = refs[1:1 + 2 * n_hidden]
        wmu_ref = refs[1 + 2 * n_hidden]
        bmu_ref = refs[2 + 2 * n_hidden]
        mu_ref = refs[3 + 2 * n_hidden]

        # Process the batch tile in static lane sub-chunks so the inter-layer
        # f32 intermediates stay small (v5e spill relief; free on v6e/v7x).
        for c in range(n_chunks):
            lo = c * chunk                                     # static offset
            h = x_ref[:, lo:lo + chunk]                        # bf16
            for li in range(n_hidden):
                w_ref = hidden_refs[2 * li]
                b_ref = hidden_refs[2 * li + 1]
                # Linear on the MXU (f32 accumulation), bias add in f32.
                y = jnp.dot(w_ref[...], h, preferred_element_type=jnp.float32)
                y = y + b_ref[...]
                # LeakyReLU(0.2): max(y, 0.2*y) — one mul + one max.
                h = jnp.maximum(y, 0.2 * y).astype(jnp.bfloat16)
            mu = jnp.dot(wmu_ref[...], h,
                         preferred_element_type=jnp.float32) + bmu_ref[...]
            mu_ref[:, lo:lo + chunk] = mu

    return kernel


# ---------------------------------------------------------------------------
# Batch-tile selection: amortize ~0.35us/step overhead, avoid padding waste,
# stay inside VMEM.  All candidates are multiples of 128 lanes.
# (On v7x, >=2 grid steps are additionally desirable to feed both TCs; for
#  large B the chosen tiles naturally give multiple steps.)
# ---------------------------------------------------------------------------
def _choose_tile_b(batch, bytes_per_row, resident_bytes,
                   vmem_budget=24 * 1024 * 1024):
    overhead_rows = max(128, 450_000 // max(bytes_per_row, 1))
    best = None
    for t in (2048, 1024, 512, 256, 128):
        stream_bytes = 2 * t * bytes_per_row      # double-buffered in/out blocks
        if t != 128 and resident_bytes + stream_bytes > vmem_budget:
            continue
        b_pad = _round_up(max(batch, 1), t)
        steps = b_pad // t
        cost = steps * overhead_rows + (b_pad - batch)
        if best is None or cost < best[2]:
            best = (t, b_pad, cost)
    return best[0], best[1]


# ---------------------------------------------------------------------------
# Wrapper
# ---------------------------------------------------------------------------
def encoder_forward(x, prepped, latent_dim):
    """x: (B, input_dim) f32.  prepped: flat tuple (w1,b1,...,wmu,bmu) from
    preprocess_params.  Returns mu: (B, latent_dim) f32 (eval-mode forward)."""
    B, in_dim = x.shape
    n_hidden = (len(prepped) - 2) // 2
    in_pad = prepped[0].shape[1]
    lat_pad = prepped[-2].shape[0]

    resident_bytes = 2 * sum(int(p.size) * p.dtype.itemsize for p in prepped)
    bytes_per_row = in_pad * 2 + lat_pad * 4      # bf16 in + f32 out per row
    tile_b, b_pad = _choose_tile_b(B, bytes_per_row, resident_bytes)
    chunk = min(CHUNK_LANES, tile_b)

    # Feature-major bf16 input (batch on lanes), one fused cast+transpose+pad.
    # TODO(synk): ideally the upstream producer emits x already in this layout
    # to remove this extra HBM pass entirely.
    x_t = jnp.pad(x.astype(jnp.bfloat16).T,
                  ((0, in_pad - in_dim), (0, b_pad - B)))

    def resident(p):
        # Same block every grid step -> weights/biases stay pinned in VMEM.
        return pl.BlockSpec(p.shape, lambda i: (0, 0))

    kernel = _make_encoder_kernel(n_hidden, chunk, tile_b // chunk)

    mu_t = pl.pallas_call(
        kernel,
        out_shape=jax.ShapeDtypeStruct((lat_pad, b_pad), jnp.float32),
        grid=(b_pad // tile_b,),
        in_specs=[pl.BlockSpec((in_pad, tile_b), lambda i: (0, i))]
                 + [resident(p) for p in prepped],
        out_specs=pl.BlockSpec((lat_pad, tile_b), lambda i: (0, i)),
        compiler_params=pltpu.CompilerParams(
            dimension_semantics=("parallel",),     # batch tiles shard over TCs
            vmem_limit_bytes=32 * 1024 * 1024,
        ),
    )(x_t, *prepped)

    # Tiny (lat_pad, B) slab -> (B, latent_dim); negligible traffic.
    return mu_t[:latent_dim, :B].T


# ---------------------------------------------------------------------------
# Parameters (PyTorch layout) + offline preprocessing
# ---------------------------------------------------------------------------
def build_raw_params(key, input_dim, hidden_dims, latent_dim):
    """Deterministic synthetic parameters in PyTorch layout.

    hidden: list of (W (out,in), b (out,), gamma, beta, run_mean, run_var)
    mu:     (W_mu (latent, out_last), b_mu (latent,))
    """
    dims = [input_dim] + list(hidden_dims)
    hidden = []
    for i in range(len(dims) - 1):
        fan_out = dims[i + 1]
        key, kw, kb, kg, kbeta, km, kv = jax.random.split(key, 7)
        w = jax.random.normal(kw, (fan_out, dims[i]), jnp.float32) * 0.05
        b = jax.random.normal(kb, (fan_out,), jnp.float32) * 0.05
        gamma = 1.0 + 0.1 * jax.random.normal(kg, (fan_out,), jnp.float32)
        beta = 0.1 * jax.random.normal(kbeta, (fan_out,), jnp.float32)
        mean = 0.1 * jax.random.normal(km, (fan_out,), jnp.float32)
        var = jax.random.uniform(kv, (fan_out,), jnp.float32,
                                 minval=0.5, maxval=1.5)
        hidden.append((w, b, gamma, beta, mean, var))
    key, kw, kb = jax.random.split(key, 3)
    w_mu = jax.random.normal(kw, (latent_dim, dims[-1]), jnp.float32) * 0.05
    b_mu = jax.random.normal(kb, (latent_dim,), jnp.float32) * 0.05
    return {"hidden": hidden, "mu": (w_mu, b_mu)}


def preprocess_params(raw, bn_eps=BN_EPS):
    """Fold BN-eval affines into the following linear layer (in f32), pad
    feature dims to 128-multiples (latent to 16), cast matmul weights bf16."""

    def pad2(a, rows, cols):
        return jnp.pad(a, ((0, rows - a.shape[0]), (0, cols - a.shape[1])))

    prepped = []
    prev_s = None   # BN scale of the previous layer (folds into this layer)
    prev_t = None   # BN shift of the previous layer
    for (w, b, gamma, beta, mean, var) in raw["hidden"]:
        if prev_s is not None:
            b = b + w @ prev_t                 # W @ t + b
            w = w * prev_s[None, :]            # W * s (scale input columns)
        out_p = _round_up(w.shape[0], LANE)
        in_p = _round_up(w.shape[1], LANE)
        prepped.append(pad2(w, out_p, in_p).astype(jnp.bfloat16))
        prepped.append(pad2(b[:, None], out_p, 1))          # bias stays f32
        prev_s = gamma / jnp.sqrt(var + bn_eps)
        prev_t = beta - mean * prev_s

    w_mu, b_mu = raw["mu"]
    b_mu = b_mu + w_mu @ prev_t
    w_mu = w_mu * prev_s[None, :]
    lat_p = _round_up(w_mu.shape[0], 16)
    in_p = _round_up(w_mu.shape[1], LANE)
    prepped.append(pad2(w_mu, lat_p, in_p).astype(jnp.bfloat16))
    prepped.append(pad2(b_mu[:, None], lat_p, 1))
    return tuple(prepped)


def encoder_reference(x, raw, bn_eps=BN_EPS):
    """Plain-JAX f32 reference reproducing the module's eval-mode forward."""
    h = x
    for (w, b, gamma, beta, mean, var) in raw["hidden"]:
        y = h @ w.T + b
        y = jnp.where(y >= 0.0, y, 0.2 * y)                     # LeakyReLU(0.2)
        h = (y - mean) / jnp.sqrt(var + bn_eps) * gamma + beta  # BatchNorm1d eval
        # Dropout: identity in eval mode.
    w_mu, b_mu = raw["mu"]
    return h @ w_mu.T + b_mu


if __name__ == "__main__":
    # Small shapes consistent with the module (Encoder over flat feature vectors).
    B = 8
    input_dim = 32
    hidden_dims = [64, 32, 16]
    latent_dim = 8

    key = jax.random.PRNGKey(0)
    key, kx, kp = jax.random.split(key, 3)
    x = jax.random.normal(kx, (B, input_dim), jnp.float32)

    raw = build_raw_params(kp, input_dim, hidden_dims, latent_dim)
    prepped = preprocess_params(raw)

    mu = encoder_forward(x, prepped, latent_dim)
    mu = jax.block_until_ready(mu)

    mu_ref = encoder_reference(x, raw)
    assert mu.shape == (B, latent_dim)
    # bf16 matmul operands (f32 accumulation) vs a pure-f32 reference.
    assert jnp.allclose(mu, mu_ref, atol=2e-2, rtol=2e-2), "mismatch vs reference"

    print("KERNEL_OK")
</pallas_src>

<mosaic_0001>
module attributes {stable_mosaic.version = 11 : i64} {
  func.func @kernel(%arg0: i32, %arg1: memref<128x128xbf16, #tpu.memory_space<vmem>>, %arg2: memref<128x128xbf16, #tpu.memory_space<vmem>>, %arg3: memref<128x1xf32, #tpu.memory_space<vmem>>, %arg4: memref<128x128xbf16, #tpu.memory_space<vmem>>, %arg5: memref<128x1xf32, #tpu.memory_space<vmem>>, %arg6: memref<128x128xbf16, #tpu.memory_space<vmem>>, %arg7: memref<128x1xf32, #tpu.memory_space<vmem>>, %arg8: memref<16x128xbf16, #tpu.memory_space<vmem>>, %arg9: memref<16x1xf32, #tpu.memory_space<vmem>>, %arg10: memref<16x128xf32, #tpu.memory_space<vmem>>) attributes {dimension_semantics = [#tpu.dimension_semantics<parallel>], iteration_bounds = array<i64: 1>, scalar_prefetch = 0 : i64, scratch_operands = 0 : i64, tpu.core_type = #tpu.core_type<tc>, window_params = [{transform_indices = @transform_0, window_bounds = array<i64: 128, 128>}, {pipeline_mode = #tpu.pipeline_mode<synchronous>, transform_indices = @transform_1, window_bounds = array<i64: 128, 128>}, {pipeline_mode = #tpu.pipeline_mode<synchronous>, transform_indices = @transform_2, window_bounds = array<i64: 128, 1>}, {pipeline_mode = #tpu.pipeline_mode<synchronous>, transform_indices = @transform_3, window_bounds = array<i64: 128, 128>}, {pipeline_mode = #tpu.pipeline_mode<synchronous>, transform_indices = @transform_4, window_bounds = array<i64: 128, 1>}, {pipeline_mode = #tpu.pipeline_mode<synchronous>, transform_indices = @transform_5, window_bounds = array<i64: 128, 128>}, {pipeline_mode = #tpu.pipeline_mode<synchronous>, transform_indices = @transform_6, window_bounds = array<i64: 128, 1>}, {pipeline_mode = #tpu.pipeline_mode<synchronous>, transform_indices = @transform_7, window_bounds = array<i64: 16, 128>}, {pipeline_mode = #tpu.pipeline_mode<synchronous>, transform_indices = @transform_8, window_bounds = array<i64: 16, 1>}, {transform_indices = @transform_9, window_bounds = array<i64: 16, 128>}]} {
    %c0 = arith.constant 0 : index
    %c0_0 = arith.constant 0 : index
    %0 = vector.load %arg1[%c0, %c0_0] : memref<128x128xbf16, #tpu.memory_space<vmem>>, vector<128x128xbf16>
    %c0_1 = arith.constant 0 : index
    %c0_2 = arith.constant 0 : index
    %1 = vector.load %arg2[%c0_1, %c0_2] : memref<128x128xbf16, #tpu.memory_space<vmem>>, vector<128x128xbf16>
    %cst = arith.constant dense<0.000000e+00> : vector<128x128xf32>
    %2 = tpu.matmul %1, %0, %cst {dimension_numbers = #tpu.dot_dimension_numbers<[1], [0], [0], [1], [0, 0, 1, 1], [], []>} : vector<128x128xbf16>, vector<128x128xbf16>, vector<128x128xf32> -> vector<128x128xf32>
    %c0_3 = arith.constant 0 : index
    %c0_4 = arith.constant 0 : index
    %3 = vector.load %arg3[%c0_3, %c0_4] : memref<128x1xf32, #tpu.memory_space<vmem>>, vector<128x1xf32>
    %4 = vector.broadcast %3 : vector<128x1xf32> to vector<128x128xf32>
    %5 = arith.addf %2, %4 : vector<128x128xf32>
    %cst_5 = arith.constant 2.000000e-01 : f32
    %6 = vector.broadcast %cst_5 : f32 to vector<128x128xf32>
    %7 = arith.mulf %6, %5 : vector<128x128xf32>
    %8 = arith.maximumf %5, %7 : vector<128x128xf32>
    %9 = arith.truncf %8 : vector<128x128xf32> to vector<128x128xbf16>
    %c0_6 = arith.constant 0 : index
    %c0_7 = arith.constant 0 : index
    %10 = vector.load %arg4[%c0_6, %c0_7] : memref<128x128xbf16, #tpu.memory_space<vmem>>, vector<128x128xbf16>
    %cst_8 = arith.constant dense<0.000000e+00> : vector<128x128xf32>
    %11 = tpu.matmul %10, %9, %cst_8 {dimension_numbers = #tpu.dot_dimension_numbers<[1], [0], [0], [1], [0, 0, 1, 1], [], []>} : vector<128x128xbf16>, vector<128x128xbf16>, vector<128x128xf32> -> vector<128x128xf32>
    %c0_9 = arith.constant 0 : index
    %c0_10 = arith.constant 0 : index
    %12 = vector.load %arg5[%c0_9, %c0_10] : memref<128x1xf32, #tpu.memory_space<vmem>>, vector<128x1xf32>
    %13 = vector.broadcast %12 : vector<128x1xf32> to vector<128x128xf32>
    %14 = arith.addf %11, %13 : vector<128x128xf32>
    %cst_11 = arith.constant 2.000000e-01 : f32
    %15 = vector.broadcast %cst_11 : f32 to vector<128x128xf32>
    %16 = arith.mulf %15, %14 : vector<128x128xf32>
    %17 = arith.maximumf %14, %16 : vector<128x128xf32>
    %18 = arith.truncf %17 : vector<128x128xf32> to vector<128x128xbf16>
    %c0_12 = arith.constant 0 : index
    %c0_13 = arith.constant 0 : index
    %19 = vector.load %arg6[%c0_12, %c0_13] : memref<128x128xbf16, #tpu.memory_space<vmem>>, vector<128x128xbf16>
    %cst_14 = arith.constant dense<0.000000e+00> : vector<128x128xf32>
    %20 = tpu.matmul %19, %18, %cst_14 {dimension_numbers = #tpu.dot_dimension_numbers<[1], [0], [0], [1], [0, 0, 1, 1], [], []>} : vector<128x128xbf16>, vector<128x128xbf16>, vector<128x128xf32> -> vector<128x128xf32>
    %c0_15 = arith.constant 0 : index
    %c0_16 = arith.constant 0 : index
    %21 = vector.load %arg7[%c0_15, %c0_16] : memref<128x1xf32, #tpu.memory_space<vmem>>, vector<128x1xf32>
    %22 = vector.broadcast %21 : vector<128x1xf32> to vector<128x128xf32>
    %23 = arith.addf %20, %22 : vector<128x128xf32>
    %cst_17 = arith.constant 2.000000e-01 : f32
    %24 = vector.broadcast %cst_17 : f32 to vector<128x128xf32>
    %25 = arith.mulf %24, %23 : vector<128x128xf32>
    %26 = arith.maximumf %23, %25 : vector<128x128xf32>
    %27 = arith.truncf %26 : vector<128x128xf32> to vector<128x128xbf16>
    %c0_18 = arith.constant 0 : index
    %c0_19 = arith.constant 0 : index
    %28 = vector.load %arg8[%c0_18, %c0_19] : memref<16x128xbf16, #tpu.memory_space<vmem>>, vector<16x128xbf16>
    %cst_20 = arith.constant dense<0.000000e+00> : vector<16x128xf32>
    %29 = tpu.matmul %28, %27, %cst_20 {dimension_numbers = #tpu.dot_dimension_numbers<[1], [0], [0], [1], [0, 0, 1, 1], [], []>} : vector<16x128xbf16>, vector<128x128xbf16>, vector<16x128xf32> -> vector<16x128xf32>
    %c0_21 = arith.constant 0 : index
    %c0_22 = arith.constant 0 : index
    %30 = vector.load %arg9[%c0_21, %c0_22] : memref<16x1xf32, #tpu.memory_space<vmem>>, vector<16x1xf32>
    %31 = vector.broadcast %30 : vector<16x1xf32> to vector<16x128xf32>
    %32 = arith.addf %29, %31 : vector<16x128xf32>
    %c0_23 = arith.constant 0 : index
    %c0_24 = arith.constant 0 : index
    %33 = vector.load %arg10[%c0_23, %c0_24] : memref<16x128xf32, #tpu.memory_space<vmem>>, vector<16x128xf32>
    tpu.vector_store %arg10[%c0_23, %c0_24], %32 {strides = array<i32>} : memref<16x128xf32, #tpu.memory_space<vmem>>, vector<16x128xf32>,
    return
  }
  func.func @transform_0(%arg0: i32) -> (i32, i32) {
    %c0_i32 = arith.constant 0 : i32
    %c0_i32_0 = arith.constant 0 : i32
    return %c0_i32, %arg0 : i32, i32
  }
  func.func @transform_1(%arg0: i32) -> (i32, i32) {
    %c0_i32 = arith.constant 0 : i32
    %c0_i32_0 = arith.constant 0 : i32
    %c0_i32_1 = arith.constant 0 : i32
    return %c0_i32, %c0_i32_0 : i32, i32
  }
  func.func @transform_2(%arg0: i32) -> (i32, i32) {
    %c0_i32 = arith.constant 0 : i32
    %c0_i32_0 = arith.constant 0 : i32
    %c0_i32_1 = arith.constant 0 : i32
    return %c0_i32, %c0_i32_0 : i32, i32
  }
  func.func @transform_3(%arg0: i32) -> (i32, i32) {
    %c0_i32 = arith.constant 0 : i32
    %c0_i32_0 = arith.constant 0 : i32
    %c0_i32_1 = arith.constant 0 : i32
    return %c0_i32, %c0_i32_0 : i32, i32
  }
  func.func @transform_4(%arg0: i32) -> (i32, i32) {
    %c0_i32 = arith.constant 0 : i32
    %c0_i32_0 = arith.constant 0 : i32
    %c0_i32_1 = arith.constant 0 : i32
    return %c0_i32, %c0_i32_0 : i32, i32
  }
  func.func @transform_5(%arg0: i32) -> (i32, i32) {
    %c0_i32 = arith.constant 0 : i32
    %c0_i32_0 = arith.constant 0 : i32
    %c0_i32_1 = arith.constant 0 : i32
    return %c0_i32, %c0_i32_0 : i32, i32
  }
  func.func @transform_6(%arg0: i32) -> (i32, i32) {
    %c0_i32 = arith.constant 0 : i32
    %c0_i32_0 = arith.constant 0 : i32
    %c0_i32_1 = arith.constant 0 : i32
    return %c0_i32, %c0_i32_0 : i32, i32
  }
  func.func @transform_7(%arg0: i32) -> (i32, i32) {
    %c0_i32 = arith.constant 0 : i32
    %c0_i32_0 = arith.constant 0 : i32
    %c0_i32_1 = arith.constant 0 : i32
    return %c0_i32, %c0_i32_0 : i32, i32
  }
  func.func @transform_8(%arg0: i32) -> (i32, i32) {
    %c0_i32 = arith.constant 0 : i32
    %c0_i32_0 = arith.constant 0 : i32
    %c0_i32_1 = arith.constant 0 : i32
    return %c0_i32, %c0_i32_0 : i32, i32
  }
  func.func @transform_9(%arg0: i32) -> (i32, i32) {
    %c0_i32 = arith.constant 0 : i32
    %c0_i32_0 = arith.constant 0 : i32
    return %c0_i32, %arg0 : i32, i32
  }
}

</mosaic_0001>

<bundles_post_ra>
// kernel: tpu_custom_call.1
= control target key start
LH: loop header
LB: loop body
LE: loop exit
PB: predicated region body
PF: predicated region fallthrough
CT: control target
= control target key end

     0   :  { %v1339_v2 = vmov 0   ;;  %s1665_s0 = inlined_call_operand.vmem [shape: bf16[128,128], index: 0, kind: input, shape index: {}]   ;;  %s1666_s1 = inlined_call_operand.vmem [shape: bf16[128,128], index: 1, kind: input, shape index: {}]   ;;  %s1667_s2 = inlined_call_operand.vmem [shape: f32[128,1], index: 2, kind: input, shape index: {}]   ;;  %s1668_s3 = inlined_call_operand.vmem [shape: bf16[128,128], index: 3, kind: input, shape index: {}]   ;;  %s1669_s4 = inlined_call_operand.vmem [shape: f32[128,1], index: 4, kind: input, shape index: {}]   ;;  %s1670_s5 = inlined_call_operand.vmem [shape: bf16[128,128], index: 5, kind: input, shape index: {}]   ;;  %s1671_s6 = inlined_call_operand.vmem [shape: f32[128,1], index: 6, kind: input, shape index: {}]   ;;  %s1672_s7 = inlined_call_operand.vmem [shape: bf16[16,128], index: 7, kind: input, shape index: {}]   ;;  %s1673_s8 = inlined_call_operand.vmem [shape: f32[16,1], index: 8, kind: input, shape index: {}]   ;;  %s1674_s9 = inlined_call_operand.hbm [shape: f32[16,128], index: 9, kind: output, shape index: {}]  }
   0x1   :  { %v1282_v0 = vld [vmem:[%s1665_s0] sm:$0xff]   ;;  %v1283_v1 = vld [vmem:[%s1665_s0 + $0x8] sm:$0xff]   ;;  %1280 = vset.pattern.permute.xlu0 %v1339_v2  ;;  %1281 = vset.pattern.permute.xlu1 %v1339_v2  ;;  %v1284_v3 = vld [vmem:[%s1665_s0 + $0x10] sm:$0xff]  }
   0x2   :  { %1158 = vmatprep.subr.bf16.mxu0 %v1282_v0  ;;  %v66_v4 = vld [vmem:[%s1667_s2] sm:$0xff]  ;;  %v68_v5 = vld [vmem:[%s1667_s2 + $0x10] sm:$0xff]  ;;  %v67_v6 = vld [vmem:[%s1667_s2 + $0x8] sm:$0xff] }
   0x3   :  { %1159 = vmatpush3.bf16.msra.mxu0 %v1282_v0  ;;  %84 = vperm.xlu0 %1280, %v66_v4   ;;  %v1285_v7 = vld [vmem:[%s1665_s0 + $0x18] sm:$0xff]   ;;  %v70_v9 = vld [vmem:[%s1667_s2 + $0x20] sm:$0xff]  ;;  %v71_v12 = vld [vmem:[%s1667_s2 + $0x28] sm:$0xff] }
   0x4   :  { %1160 = vmatprep.subr.bf16.mxu0 %v1283_v1  ;;  %94 = vperm.xlu1 %1281, %v68_v5   ;;  %v69_v8 = vld [vmem:[%s1667_s2 + $0x18] sm:$0xff]  ;;  %v1290_v10 = vld [vmem:[%s1666_s1] sm:$0xff]   ;;  %v72_v13 = vld [vmem:[%s1667_s2 + $0x30] sm:$0xff] }
   0x5   :  { %v1286_v11 = vld [vmem:[%s1665_s0 + $0x20] sm:$0xff]   ;;  %1174 = vmatprep.mubr.bf16.mxu0 %v1290_v10  ;;  %v1287_v14 = vld [vmem:[%s1665_s0 + $0x28] sm:$0xff]   ;;  %v73_v15 = vld [vmem:[%s1667_s2 + $0x38] sm:$0xff] }
   0x6   :  { %v1288_v16 = vld [vmem:[%s1665_s0 + $0x30] sm:$0xff]   ;;  %v74_v17 = vld [vmem:[%s1667_s2 + $0x40] sm:$0xff]  ;;  %v75_v18 = vld [vmem:[%s1667_s2 + $0x48] sm:$0xff] }
   0x7   :  { %1161 = vmatpush3.bf16.msra.mxu0 %v1283_v1  ;;  %89 = vperm.xlu0 %1280, %v67_v6   ;;  %v76_v19 = vld [vmem:[%s1667_s2 + $0x50] sm:$0xff]  ;;  %v1289_v20 = vld [vmem:[%s1665_s0 + $0x38] sm:$0xff]   ;;  %v78_v22 = vld [vmem:[%s1667_s2 + $0x60] sm:$0xff] }
   0x8   :  { %1162 = vmatprep.subr.bf16.mxu0 %v1284_v3  ;;  %99 = vperm.xlu1 %1281, %v69_v8   ;;  %v77_v21 = vld [vmem:[%s1667_s2 + $0x58] sm:$0xff]  ;;  %v79_v23 = vld [vmem:[%s1667_s2 + $0x68] sm:$0xff]  ;;  %v1292_v25 = vld [vmem:[%s1666_s1 + $0x10] sm:$0xff]  }
   0x9   :  { %v1291_v24 = vld [vmem:[%s1666_s1 + $0x8] sm:$0xff]   ;;  %v80_v26 = vld [vmem:[%s1667_s2 + $0x70] sm:$0xff]  ;;  %v81_v27 = vld [vmem:[%s1667_s2 + $0x78] sm:$0xff] }
   0xa   :  { %v411_v28 = vld [vmem:[%s1669_s4] sm:$0xff]  ;;  %v412_v29 = vld [vmem:[%s1669_s4 + $0x8] sm:$0xff]  ;;  %v1293_v30 = vld [vmem:[%s1666_s1 + $0x18] sm:$0xff]  }
   0xb   :  { %1163 = vmatpush3.bf16.msra.mxu0 %v1284_v3  ;;  %104 = vperm.xlu0 %1280, %v70_v9   ;;  %v1294_v31 = vld [vmem:[%s1666_s1 + $0x20] sm:$0xff]   ;;  %v413_v32 = vld [vmem:[%s1669_s4 + $0x10] sm:$0xff]  ;;  %v414_v33 = vld [vmem:[%s1669_s4 + $0x18] sm:$0xff] }
   0xc   :  { %1164 = vmatprep.subr.bf16.mxu0 %v1285_v7  ;;  %109 = vperm.xlu1 %1281, %v71_v12   ;;  %v415_v34 = vld [vmem:[%s1669_s4 + $0x20] sm:$0xff]  ;;  %v416_v35 = vld [vmem:[%s1669_s4 + $0x28] sm:$0xff] }
   0xf   :  { %1165 = vmatpush3.bf16.msra.mxu0 %v1285_v7  ;;  %114 = vperm.xlu0 %1280, %v72_v13  }
  0x10   :  { %1166 = vmatprep.subr.bf16.mxu0 %v1286_v11  ;;  %119 = vperm.xlu1 %1281, %v73_v15  }
  0x13   :  { %1167 = vmatpush3.bf16.msra.mxu0 %v1286_v11  ;;  %124 = vperm.xlu0 %1280, %v74_v17  }
  0x14   :  { %1168 = vmatprep.subr.bf16.mxu0 %v1287_v14  ;;  %129 = vperm.xlu1 %1281, %v75_v18  }
  0x17   :  { %1169 = vmatpush3.bf16.msra.mxu0 %v1287_v14  ;;  %134 = vperm.xlu0 %1280, %v76_v19  }
  0x18   :  { %1170 = vmatprep.subr.bf16.mxu0 %v1288_v16  ;;  %139 = vperm.xlu1 %1281, %v77_v21  }
  0x1b   :  { %1171 = vmatpush3.bf16.msra.mxu0 %v1288_v16  ;;  %144 = vperm.xlu0 %1280, %v78_v22  }
  0x1c   :  { %1172 = vmatprep.subr.bf16.mxu0 %v1289_v20  ;;  %149 = vperm.xlu1 %1281, %v79_v23  }
  0x1f   :  { %1173 = vmatpush3.bf16.msra.mxu0 %v1289_v20  ;;  %154 = vperm.xlu0 %1280, %v80_v26  }
  0x20   :  { %159 = vperm.xlu1 %1281, %v81_v27  }
  0x22   :  { %1175 = vmatmul.mubr.bf16.vlgmr.msra.gmra.mrb[0].mxu0 %v1291_v24 }
  0x23   :  { %1178 = vmatprep.mubr.bf16.mxu0 %v1292_v25  ;;  %429 = vperm.xlu0 %1280, %v411_v28  }
  0x24   :  { %434 = vperm.xlu1 %1281, %v412_v29  }
  0x27   :  { %439 = vperm.xlu0 %1280, %v413_v32  }
  0x28   :  { %444 = vperm.xlu1 %1281, %v414_v33  }
  0x2a   :  { %1179 = vmatmul.mubr.bf16.gmra.mrb[4].mxu0 %v1293_v30 }
  0x2b   :  { %1182 = vmatprep.mubr.bf16.mxu0 %v1294_v31 }
  0x2c   :  { %14 = vsyncpa [#allocation3], 0  ;;  %v1295_v36 = vld [vmem:[%s1666_s1 + $0x28] sm:$0xff]   ;;  %449 = vperm.xlu0 %1280, %v415_v34   ;;  %v1296_v37 = vld [vmem:[%s1666_s1 + $0x30] sm:$0xff]   ;;  %454 = vperm.xlu1 %1281, %v416_v35   ;;  %vm1341_vm0 = vmmov 0   ;;  %s1342_s2 = smov [#allocation2]  }
  0x2d   :  { %v417_v38 = vld [vmem:[%s1669_s4 + $0x30] sm:$0xff]  ;;  %v418_v39 = vld [vmem:[%s1669_s4 + $0x38] sm:$0xff]  ;;  %v419_v40 = vld [vmem:[%s1669_s4 + $0x40] sm:$0xff]  ;;  %s1057_s28 = sshll.u32 %s1342_s2, 4  ;;  %s1058_s28 = int_to_ptr.vmem [resolvable:$true] %s1057_s28 }
  0x2e   :  { %v420_v41 = vld [vmem:[%s1669_s4 + $0x48] sm:$0xff]  ;;  %v1297_v42 = vld [vmem:[%s1666_s1 + $0x38] sm:$0xff]   ;;  %v421_v43 = vld [vmem:[%s1669_s4 + $0x50] sm:$0xff]  ;;  %s1315_s29 = scalar_lea.vmem %s1058_s28, 256  ;;  %p1320_p1 = scmp.lt.s32.totalorder %s1058_s28, %s1058_s28 }
  0x2f   :  { %v422_v44 = vld [vmem:[%s1669_s4 + $0x58] sm:$0xff]  ;;  %v423_v45 = vld [vmem:[%s1669_s4 + $0x60] sm:$0xff]  ;;  %v424_v46 = vld [vmem:[%s1669_s4 + $0x68] sm:$0xff]  ;;  %p1316_p0 = scmp.ne.s32.totalorder %s1058_s28, %s1315_s29  ;;  %p1321_p2 = scmp.lt.s32.totalorder %s1315_s29, %s1315_s29 }
  0x30   :  { %459 = vperm.xlu0 %1280, %v417_v38   ;;  %464 = vperm.xlu1 %1281, %v418_v39   ;;  %v425_v47 = vld [vmem:[%s1669_s4 + $0x70] sm:$0xff]  ;;  %v426_v48 = vld [vmem:[%s1669_s4 + $0x78] sm:$0xff]  ;;  %v708_v49 = vld [vmem:[%s1671_s6] sm:$0xff] }
  0x31   :  { %v709_v50 = vld [vmem:[%s1671_s6 + $0x8] sm:$0xff]  ;;  %v710_v51 = vld [vmem:[%s1671_s6 + $0x10] sm:$0xff]  ;;  %v711_v52 = vld [vmem:[%s1671_s6 + $0x18] sm:$0xff]  ;;  %p1322_p3 = por %p1321_p2, %p1320_p1 }
  0x32   :  { %1183 = vmatmul.mubr.bf16.gmra.mrb[8].mxu0 %v1295_v36  ;;  %v712_v53 = vld [vmem:[%s1671_s6 + $0x20] sm:$0xff]  ;;  %v713_v54 = vld [vmem:[%s1671_s6 + $0x28] sm:$0xff]  ;;  %v714_v55 = vld [vmem:[%s1671_s6 + $0x30] sm:$0xff] }
  0x33   :  { %1186 = vmatprep.mubr.bf16.mxu0 %v1296_v37  ;;  %v715_v56 = vld [vmem:[%s1671_s6 + $0x38] sm:$0xff]  ;;  %v716_v57 = vld [vmem:[%s1671_s6 + $0x40] sm:$0xff]  ;;  %v717_v58 = vld [vmem:[%s1671_s6 + $0x48] sm:$0xff]  ;;  %p1323_p4 = pnand %p1322_p3, %p1316_p0 }
  0x34   :  { %469 = vperm.xlu0 %1280, %v419_v40   ;;  %474 = vperm.xlu1 %1281, %v420_v41   ;;  %v718_v59 = vld [vmem:[%s1671_s6 + $0x50] sm:$0xff]  ;;  %v719_v60 = vld [vmem:[%s1671_s6 + $0x58] sm:$0xff]  ;;  %v720_v61 = vld [vmem:[%s1671_s6 + $0x60] sm:$0xff] }
  0x35   :  { %v721_v62 = vld [vmem:[%s1671_s6 + $0x68] sm:$0xff]  ;;  %v722_v63 = vld [vmem:[%s1671_s6 + $0x70] sm:$0xff]  ;;  %v723_v0 = vld [vmem:[%s1671_s6 + $0x78] sm:$0xff] }
  0x36   :  { %v991_v1 = vld [vmem:[%s1673_s8] sm:$0xff]  ;;  %v992_v2 = vld [vmem:[%s1673_s8 + $0x8] sm:$0xff] }
  0x37   :  { %v1298_v3 = vld [vmem:[%s1668_s3] sm:$0xff]  }
  0x38   :  { %479 = vperm.xlu0 %1280, %v421_v43   ;;  %484 = vperm.xlu1 %1281, %v422_v44  }
  0x39   :  { %1206 = vmatprep.mubr.bf16.mxu1 %v1298_v3 }
  0x3a   :  { %1187 = vmatmul.mubr.bf16.gmra.mrb[12].mxu0 %v1297_v42 }
  0x3c   :  { %489 = vperm.xlu0 %1280, %v423_v45   ;;  %494 = vperm.xlu1 %1281, %v424_v46  }
  0x40   :  { %499 = vperm.xlu0 %1280, %v425_v47   ;;  %504 = vperm.xlu1 %1281, %v426_v48  }
  0x44   :  { %726 = vperm.xlu0 %1280, %v708_v49   ;;  %731 = vperm.xlu1 %1281, %v709_v50  }
  0x48   :  { %736 = vperm.xlu0 %1280, %v710_v51   ;;  %741 = vperm.xlu1 %1281, %v711_v52  }
  0x4c   :  { %746 = vperm.xlu0 %1280, %v712_v53   ;;  %751 = vperm.xlu1 %1281, %v713_v54  }
  0x50   :  { %756 = vperm.xlu0 %1280, %v714_v55   ;;  %761 = vperm.xlu1 %1281, %v715_v56  }
  0x54   :  { %766 = vperm.xlu0 %1280, %v716_v57   ;;  %771 = vperm.xlu1 %1281, %v717_v58  }
  0x58   :  { %776 = vperm.xlu0 %1280, %v718_v59   ;;  %781 = vperm.xlu1 %1281, %v719_v60  }
  0x5c   :  { %786 = vperm.xlu0 %1280, %v720_v61   ;;  %791 = vperm.xlu1 %1281, %v721_v62  }
  0x60   :  { %796 = vperm.xlu0 %1280, %v722_v63   ;;  %801 = vperm.xlu1 %1281, %v723_v0  }
  0x64   :  { %995 = vperm.xlu0 %1280, %v991_v1   ;;  %1000 = vperm.xlu1 %1281, %v992_v2  }
  0x82   :  { %v85_v4 = vpop.permute.xlu0 %84 }
  0x83   :  { %v95_v5 = vpop.permute.xlu1 %94 }
  0x86   :  { %v90_v6 = vpop.permute.xlu0 %89 }
  0x87   :  { %v100_v7 = vpop.permute.xlu1 %99 }
  0x8a   :  { %v105_v8 = vpop.permute.xlu0 %104 }
  0x8b   :  { %v110_v9 = vpop.permute.xlu1 %109 }
  0x8e   :  { %v115_v10 = vpop.permute.xlu0 %114 }
  0x8f   :  { %v120_v14 = vpop.permute.xlu1 %119 }
  0x92   :  { %v125_v23 = vpop.permute.xlu0 %124 }
  0x93   :  { %v130_v27 = vpop.permute.xlu1 %129 }
  0x96   :  { %v135_v40 = vpop.permute.xlu0 %134 }
  0x97   :  { %v140_v44 = vpop.permute.xlu1 %139 }
  0x9a   :  { %v145_v54 = vpop.permute.xlu0 %144 }
  0x9b   :  { %v150_v61 = vpop.permute.xlu1 %149 }
  0xf5   :  { %v1176_v11 = vpop.f32.mrb[0].mxu0 }
  0xf6   :  { %v301_v12 = vadd.f32 %v1176_v11, %v95_v5  ;;  %v292_v13 = vpop.f32.mrb[1].mxu0  ;;  %v160_v11 = vpop.permute.xlu1 %159 }
  0xf7   :  { %v293_v15 = vadd.f32 %v292_v13, %v85_v4  ;;  %v1177_v16 = vpop.f32.mrb[2].mxu0  ;;  %v155_v4 = vpop.permute.xlu0 %154 }
  0xf8   :  { %v357_v17 = vmul.f32 0.2, %v301_v12  ;;  %v304_v18 = vadd.f32 %v1177_v16, %v100_v7  ;;  %v295_v19 = vpop.f32.mrb[3].mxu0 }
  0xf9   :  { %v355_v20 = vmul.f32 0.2, %v293_v15  ;;  %v296_v21 = vadd.f32 %v295_v19, %v90_v6 }
  0xfa   :  { %v358_v22 = vmul.f32 0.2, %v304_v18  ;;  %v373_v25 = vmax.f32 %v301_v12, %v357_v17 }
  0xfb   :  { %v356_v24 = vmul.f32 0.2, %v296_v21  ;;  %v371_v28 = vmax.f32 %v293_v15, %v355_v20 }
  0xfc   :  { %v374_v26 = vmax.f32 %v304_v18, %v358_v22 }
  0xfd   :  { %v372_v29 = vmax.f32 %v296_v21, %v356_v24  ;;  %v1180_v30 = vpop.f32.mrb[4].mxu0 }
  0xfe   :  { %v317_v31 = vadd.f32 %v1180_v30, %v115_v10  ;;  %v308_v32 = vpop.f32.mrb[5].mxu0  ;;  %v388_v33 = vpack.c.bf16 %v374_v26, %v373_v25  ;;  %v1301_v30 = vld [vmem:[%s1668_s3 + $0x18] sm:$0xff]  }
  0xff   :  { %v309_v34 = vadd.f32 %v308_v32, %v105_v8  ;;  %v1181_v35 = vpop.f32.mrb[6].mxu0  ;;  %v387_v36 = vpack.c.bf16 %v372_v29, %v371_v28  ;;  %v1299_v28 = vld [vmem:[%s1668_s3 + $0x8] sm:$0xff]   ;;  %v1300_v29 = vld [vmem:[%s1668_s3 + $0x10] sm:$0xff]  }
 0x100   :  { %v361_v37 = vmul.f32 0.2, %v317_v31  ;;  %v320_v38 = vadd.f32 %v1181_v35, %v120_v14  ;;  %v311_v39 = vpop.f32.mrb[7].mxu0  ;;  %v1303_v32 = vld [vmem:[%s1668_s3 + $0x28] sm:$0xff]   ;;  %v1306_v35 = vld [vmem:[%s1670_s5] sm:$0xff]  }
 0x101   :  { %v359_v41 = vmul.f32 0.2, %v309_v34  ;;  %v312_v42 = vadd.f32 %v311_v39, %v110_v9  ;;  %1190 = vmatprep.subr.bf16.mxu1 %v387_v36  ;;  %1238 = vmatprep.mubr.bf16.mxu0 %v1306_v35 }
 0x102   :  { %v362_v43 = vmul.f32 0.2, %v320_v38  ;;  %1191 = vmatpush3.bf16.msra.mxu1 %v387_v36  ;;  %v377_v46 = vmax.f32 %v317_v31, %v361_v37  ;;  %v1302_v31 = vld [vmem:[%s1668_s3 + $0x20] sm:$0xff]   ;;  %v430_v36 = vpop.permute.xlu0 %429  ;;  %v435_v37 = vpop.permute.xlu1 %434 }
 0x103   :  { %v360_v45 = vmul.f32 0.2, %v312_v42  ;;  %1192 = vmatprep.subr.bf16.mxu1 %v388_v33  ;;  %v375_v48 = vmax.f32 %v309_v34, %v359_v41  ;;  %v1305_v34 = vld [vmem:[%s1668_s3 + $0x38] sm:$0xff]  }
 0x104   :  { %v378_v47 = vmax.f32 %v320_v38, %v362_v43 }
 0x105   :  { %v376_v49 = vmax.f32 %v312_v42, %v360_v45  ;;  %v1184_v50 = vpop.f32.mrb[8].mxu0 }
 0x106   :  { %v333_v51 = vadd.f32 %v1184_v50, %v135_v40  ;;  %v324_v52 = vpop.f32.mrb[9].mxu0  ;;  %1193 = vmatpush3.bf16.msra.mxu1 %v388_v33  ;;  %v390_v53 = vpack.c.bf16 %v378_v47, %v377_v46  ;;  %v1304_v33 = vld [vmem:[%s1668_s3 + $0x30] sm:$0xff]   ;;  %v440_v38 = vpop.permute.xlu0 %439 }
 0x107   :  { %v325_v55 = vadd.f32 %v324_v52, %v125_v23  ;;  %v1185_v56 = vpop.f32.mrb[10].mxu0  ;;  %v389_v57 = vpack.c.bf16 %v376_v49, %v375_v48  ;;  %v445_v39 = vpop.permute.xlu1 %444 }
 0x108   :  { %v365_v58 = vmul.f32 0.2, %v333_v51  ;;  %v336_v59 = vadd.f32 %v1185_v56, %v140_v44  ;;  %v327_v60 = vpop.f32.mrb[11].mxu0 }
 0x109   :  { %v363_v62 = vmul.f32 0.2, %v325_v55  ;;  %v328_v63 = vadd.f32 %v327_v60, %v130_v27  ;;  %1194 = vmatprep.subr.bf16.mxu1 %v389_v57 }
 0x10a   :  { %v366_v0 = vmul.f32 0.2, %v336_v59  ;;  %1195 = vmatpush3.bf16.msra.mxu1 %v389_v57  ;;  %v381_v2 = vmax.f32 %v333_v51, %v365_v58  ;;  %v450_v40 = vpop.permute.xlu0 %449 }
 0x10b   :  { %v364_v1 = vmul.f32 0.2, %v328_v63  ;;  %1196 = vmatprep.subr.bf16.mxu1 %v390_v53  ;;  %v379_v5 = vmax.f32 %v325_v55, %v363_v62  ;;  %v455_v41 = vpop.permute.xlu1 %454 }
 0x10c   :  { %v382_v3 = vmax.f32 %v336_v59, %v366_v0 }
 0x10d   :  { %v380_v6 = vmax.f32 %v328_v63, %v364_v1  ;;  %v1188_v7 = vpop.f32.mrb[12].mxu0 }
 0x10e   :  { %v349_v8 = vadd.f32 %v1188_v7, %v155_v4  ;;  %v340_v9 = vpop.f32.mrb[13].mxu0  ;;  %1197 = vmatpush3.bf16.msra.mxu1 %v390_v53  ;;  %v392_v10 = vpack.c.bf16 %v382_v3, %v381_v2  ;;  %v460_v42 = vpop.permute.xlu0 %459 }
 0x10f   :  { %v341_v12 = vadd.f32 %v340_v9, %v145_v54  ;;  %v1189_v13 = vpop.f32.mrb[14].mxu0  ;;  %v391_v14 = vpack.c.bf16 %v380_v6, %v379_v5  ;;  %v465_v46 = vpop.permute.xlu1 %464 }
 0x110   :  { %v369_v15 = vmul.f32 0.2, %v349_v8  ;;  %v352_v16 = vadd.f32 %v1189_v13, %v160_v11  ;;  %v343_v17 = vpop.f32.mrb[15].mxu0 }
 0x111   :  { %v367_v18 = vmul.f32 0.2, %v341_v12  ;;  %v344_v19 = vadd.f32 %v343_v17, %v150_v61  ;;  %1198 = vmatprep.subr.bf16.mxu1 %v391_v14 }
 0x112   :  { %v370_v20 = vmul.f32 0.2, %v352_v16  ;;  %1199 = vmatpush3.bf16.msra.mxu1 %v391_v14  ;;  %v385_v22 = vmax.f32 %v349_v8, %v369_v15  ;;  %v470_v55 = vpop.permute.xlu0 %469 }
 0x113   :  { %v368_v21 = vmul.f32 0.2, %v344_v19  ;;  %1200 = vmatprep.subr.bf16.mxu1 %v392_v10  ;;  %v383_v24 = vmax.f32 %v341_v12, %v367_v18  ;;  %v475_v59 = vpop.permute.xlu1 %474 }
 0x114   :  { %v386_v23 = vmax.f32 %v352_v16, %v370_v20 }
 0x115   :  { %v384_v25 = vmax.f32 %v344_v19, %v368_v21 }
 0x116   :  { %1201 = vmatpush3.bf16.msra.mxu1 %v392_v10  ;;  %v394_v26 = vpack.c.bf16 %v386_v23, %v385_v22  ;;  %v480_v8 = vpop.permute.xlu0 %479 }
 0x117   :  { %v393_v27 = vpack.c.bf16 %v384_v25, %v383_v24  ;;  %v485_v12 = vpop.permute.xlu1 %484 }
 0x119   :  { %1202 = vmatprep.subr.bf16.mxu1 %v393_v27 }
 0x11a   :  { %1203 = vmatpush3.bf16.msra.mxu1 %v393_v27  ;;  %v490_v22 = vpop.permute.xlu0 %489 }
 0x11b   :  { %1204 = vmatprep.subr.bf16.mxu1 %v394_v26 }
 0x11e   :  { %1205 = vmatpush3.bf16.msra.mxu1 %v394_v26 }
 0x121   :  { %1207 = vmatmul.mubr.bf16.vlgmr.msra.gmra.mrb[0].mxu1 %v1299_v28 }
 0x122   :  { %1210 = vmatprep.mubr.bf16.mxu1 %v1300_v29  ;;  %v495_v29 = vpop.permute.xlu1 %494 }
 0x129   :  { %1211 = vmatmul.mubr.bf16.gmra.mrb[4].mxu1 %v1301_v30 }
 0x12a   :  { %1214 = vmatprep.mubr.bf16.mxu1 %v1302_v31 }
 0x131   :  { %1215 = vmatmul.mubr.bf16.gmra.mrb[8].mxu1 %v1303_v32 }
 0x132   :  { %1218 = vmatprep.mubr.bf16.mxu1 %v1304_v33 }
 0x139   :  { %1219 = vmatmul.mubr.bf16.gmra.mrb[12].mxu1 %v1305_v34 }
 0x1f4   :  { %v1208_v43 = vpop.f32.mrb[0].mxu1 }
 0x1f5   :  { %v598_v44 = vadd.f32 %v1208_v43, %v440_v38  ;;  %v589_v45 = vpop.f32.mrb[1].mxu1  ;;  %v505_v43 = vpop.permute.xlu1 %504 }
 0x1f6   :  { %v590_v47 = vadd.f32 %v589_v45, %v430_v36  ;;  %v1209_v48 = vpop.f32.mrb[2].mxu1  ;;  %v500_v36 = vpop.permute.xlu0 %499 }
 0x1f7   :  { %v654_v49 = vmul.f32 0.2, %v598_v44  ;;  %v601_v50 = vadd.f32 %v1209_v48, %v445_v39  ;;  %v592_v51 = vpop.f32.mrb[3].mxu1 }
 0x1f8   :  { %v652_v52 = vmul.f32 0.2, %v590_v47  ;;  %v593_v53 = vadd.f32 %v592_v51, %v435_v37 }
 0x1f9   :  { %v655_v54 = vmul.f32 0.2, %v601_v50  ;;  %v670_v57 = vmax.f32 %v598_v44, %v654_v49 }
 0x1fa   :  { %v653_v56 = vmul.f32 0.2, %v593_v53  ;;  %v668_v60 = vmax.f32 %v590_v47, %v652_v52 }
 0x1fb   :  { %v671_v58 = vmax.f32 %v601_v50, %v655_v54 }
 0x1fc   :  { %v669_v61 = vmax.f32 %v593_v53, %v653_v56  ;;  %v1212_v62 = vpop.f32.mrb[4].mxu1 }
 0x1fd   :  { %v614_v63 = vadd.f32 %v1212_v62, %v460_v42  ;;  %v605_v0 = vpop.f32.mrb[5].mxu1  ;;  %v685_v1 = vpack.c.bf16 %v671_v58, %v670_v57  ;;  %v1309_v62 = vld [vmem:[%s1670_s5 + $0x18] sm:$0xff]  }
 0x1fe   :  { %v606_v2 = vadd.f32 %v605_v0, %v450_v40  ;;  %v1213_v3 = vpop.f32.mrb[6].mxu1  ;;  %v684_v4 = vpack.c.bf16 %v669_v61, %v668_v60  ;;  %v1307_v60 = vld [vmem:[%s1670_s5 + $0x8] sm:$0xff]   ;;  %v1308_v61 = vld [vmem:[%s1670_s5 + $0x10] sm:$0xff]  }
 0x1ff   :  { %v658_v5 = vmul.f32 0.2, %v614_v63  ;;  %v617_v6 = vadd.f32 %v1213_v3, %v465_v46  ;;  %v608_v7 = vpop.f32.mrb[7].mxu1  ;;  %v1311_v0 = vld [vmem:[%s1670_s5 + $0x28] sm:$0xff]   ;;  %v1340_v3 = vmov 0.0  }
 0x200   :  { %v656_v9 = vmul.f32 0.2, %v606_v2  ;;  %v609_v10 = vadd.f32 %v608_v7, %v455_v41  ;;  %1222 = vmatprep.subr.bf16.mxu0 %v684_v4  ;;  %1254 = vmatprep.subr.bf16.mxu1 %v1340_v3 }
 0x201   :  { %v659_v11 = vmul.f32 0.2, %v617_v6  ;;  %1223 = vmatpush3.bf16.msra.mxu0 %v684_v4  ;;  %v674_v14 = vmax.f32 %v614_v63, %v658_v5  ;;  %v1310_v63 = vld [vmem:[%s1670_s5 + $0x20] sm:$0xff]   ;;  %1270 = vmatprep.mubr.msk.bf16.mxu1 %vm1341_vm0, %v1340_v3  ;;  %v727_v4 = vpop.permute.xlu0 %726  ;;  %v732_v5 = vpop.permute.xlu1 %731 }
 0x202   :  { %v657_v13 = vmul.f32 0.2, %v609_v10  ;;  %1224 = vmatprep.subr.bf16.mxu0 %v685_v1  ;;  %v672_v16 = vmax.f32 %v606_v2, %v656_v9  ;;  %v1313_v2 = vld [vmem:[%s1670_s5 + $0x38] sm:$0xff]  }
 0x203   :  { %v675_v15 = vmax.f32 %v617_v6, %v659_v11 }
 0x204   :  { %v673_v17 = vmax.f32 %v609_v10, %v657_v13  ;;  %v1216_v18 = vpop.f32.mrb[8].mxu1 }
 0x205   :  { %v630_v19 = vadd.f32 %v1216_v18, %v480_v8  ;;  %v621_v20 = vpop.f32.mrb[9].mxu1  ;;  %1225 = vmatpush3.bf16.msra.mxu0 %v685_v1  ;;  %v687_v21 = vpack.c.bf16 %v675_v15, %v674_v14  ;;  %v1312_v1 = vld [vmem:[%s1670_s5 + $0x30] sm:$0xff]   ;;  %v737_v6 = vpop.permute.xlu0 %736 }
 0x206   :  { %v622_v23 = vadd.f32 %v621_v20, %v470_v55  ;;  %v1217_v24 = vpop.f32.mrb[10].mxu1  ;;  %v686_v25 = vpack.c.bf16 %v673_v17, %v672_v16  ;;  %v742_v7 = vpop.permute.xlu1 %741 }
 0x207   :  { %v662_v26 = vmul.f32 0.2, %v630_v19  ;;  %v633_v27 = vadd.f32 %v1217_v24, %v485_v12  ;;  %v624_v28 = vpop.f32.mrb[11].mxu1 }
 0x208   :  { %v660_v30 = vmul.f32 0.2, %v622_v23  ;;  %v625_v31 = vadd.f32 %v624_v28, %v475_v59  ;;  %1226 = vmatprep.subr.bf16.mxu0 %v686_v25 }
 0x209   :  { %v663_v32 = vmul.f32 0.2, %v633_v27  ;;  %1227 = vmatpush3.bf16.msra.mxu0 %v686_v25  ;;  %v678_v34 = vmax.f32 %v630_v19, %v662_v26  ;;  %v747_v8 = vpop.permute.xlu0 %746 }
 0x20a   :  { %v661_v33 = vmul.f32 0.2, %v625_v31  ;;  %1228 = vmatprep.subr.bf16.mxu0 %v687_v21  ;;  %v676_v37 = vmax.f32 %v622_v23, %v660_v30  ;;  %v752_v9 = vpop.permute.xlu1 %751 }
 0x20b   :  { %v679_v35 = vmax.f32 %v633_v27, %v663_v32 }
 0x20c   :  { %v677_v38 = vmax.f32 %v625_v31, %v661_v33  ;;  %v1220_v39 = vpop.f32.mrb[12].mxu1 }
 0x20d   :  { %v646_v40 = vadd.f32 %v1220_v39, %v500_v36  ;;  %v637_v41 = vpop.f32.mrb[13].mxu1  ;;  %1229 = vmatpush3.bf16.msra.mxu0 %v687_v21  ;;  %v689_v42 = vpack.c.bf16 %v679_v35, %v678_v34  ;;  %v757_v10 = vpop.permute.xlu0 %756 }
 0x20e   :  { %v638_v44 = vadd.f32 %v637_v41, %v490_v22  ;;  %v1221_v45 = vpop.f32.mrb[14].mxu1  ;;  %v688_v46 = vpack.c.bf16 %v677_v38, %v676_v37  ;;  %v762_v14 = vpop.permute.xlu1 %761 }
 0x20f   :  { %v666_v47 = vmul.f32 0.2, %v646_v40  ;;  %v649_v48 = vadd.f32 %v1221_v45, %v505_v43  ;;  %v640_v49 = vpop.f32.mrb[15].mxu1 }
 0x210   :  { %v664_v50 = vmul.f32 0.2, %v638_v44  ;;  %v641_v51 = vadd.f32 %v640_v49, %v495_v29  ;;  %1230 = vmatprep.subr.bf16.mxu0 %v688_v46 }
 0x211   :  { %v667_v52 = vmul.f32 0.2, %v649_v48  ;;  %1231 = vmatpush3.bf16.msra.mxu0 %v688_v46  ;;  %v682_v54 = vmax.f32 %v646_v40, %v666_v47  ;;  %v767_v23 = vpop.permute.xlu0 %766 }
 0x212   :  { %v665_v53 = vmul.f32 0.2, %v641_v51  ;;  %1232 = vmatprep.subr.bf16.mxu0 %v689_v42  ;;  %v680_v56 = vmax.f32 %v638_v44, %v664_v50  ;;  %v772_v27 = vpop.permute.xlu1 %771 }
 0x213   :  { %v683_v55 = vmax.f32 %v649_v48, %v667_v52 }
 0x214   :  { %v681_v57 = vmax.f32 %v641_v51, %v665_v53 }
 0x215   :  { %1233 = vmatpush3.bf16.msra.mxu0 %v689_v42  ;;  %v691_v58 = vpack.c.bf16 %v683_v55, %v682_v54  ;;  %v777_v40 = vpop.permute.xlu0 %776 }
 0x216   :  { %v690_v59 = vpack.c.bf16 %v681_v57, %v680_v56  ;;  %v782_v44 = vpop.permute.xlu1 %781 }
 0x218   :  { %1234 = vmatprep.subr.bf16.mxu0 %v690_v59 }
 0x219   :  { %1235 = vmatpush3.bf16.msra.mxu0 %v690_v59  ;;  %v787_v54 = vpop.permute.xlu0 %786 }
 0x21a   :  { %1236 = vmatprep.subr.bf16.mxu0 %v691_v58 }
 0x21d   :  { %1237 = vmatpush3.bf16.msra.mxu0 %v691_v58 }
 0x220   :  { %1239 = vmatmul.mubr.bf16.vlgmr.msra.gmra.mrb[16].mxu0 %v1307_v60 }
 0x221   :  { %1242 = vmatprep.mubr.bf16.mxu0 %v1308_v61  ;;  %v792_v61 = vpop.permute.xlu1 %791 }
 0x228   :  { %1243 = vmatmul.mubr.bf16.gmra.mrb[20].mxu0 %v1309_v62 }
 0x229   :  { %1246 = vmatprep.mubr.bf16.mxu0 %v1310_v63 }
 0x230   :  { %1247 = vmatmul.mubr.bf16.gmra.mrb[24].mxu0 %v1311_v0 }
 0x231   :  { %1250 = vmatprep.mubr.bf16.mxu0 %v1312_v1 }
 0x238   :  { %1251 = vmatmul.mubr.bf16.gmra.mrb[28].mxu0 %v1313_v2 }
 0x2f3   :  { %v1240_v11 = vpop.f32.mrb[16].mxu0 }
 0x2f4   :  { %v895_v12 = vadd.f32 %v1240_v11, %v737_v6  ;;  %v886_v13 = vpop.f32.mrb[17].mxu0 }
 0x2f5   :  { %v887_v15 = vadd.f32 %v886_v13, %v727_v4  ;;  %v1241_v16 = vpop.f32.mrb[18].mxu0 }
 0x2f6   :  { %v951_v17 = vmul.f32 0.2, %v895_v12  ;;  %v898_v18 = vadd.f32 %v1241_v16, %v742_v7  ;;  %v889_v19 = vpop.f32.mrb[19].mxu0 }
 0x2f7   :  { %v949_v20 = vmul.f32 0.2, %v887_v15  ;;  %v890_v21 = vadd.f32 %v889_v19, %v732_v5  ;;  %v797_v5 = vpop.permute.xlu0 %796 }
 0x2f8   :  { %v952_v22 = vmul.f32 0.2, %v898_v18  ;;  %v967_v25 = vmax.f32 %v895_v12, %v951_v17  ;;  %v802_v12 = vpop.permute.xlu1 %801 }
 0x2f9   :  { %v950_v24 = vmul.f32 0.2, %v890_v21  ;;  %v965_v28 = vmax.f32 %v887_v15, %v949_v20 }
 0x2fa   :  { %v968_v26 = vmax.f32 %v898_v18, %v952_v22 }
 0x2fb   :  { %v966_v29 = vmax.f32 %v890_v21, %v950_v24  ;;  %v1244_v30 = vpop.f32.mrb[20].mxu0 }
 0x2fc   :  { %v982_v31 = vpack.c.bf16 %v968_v26, %v967_v25  ;;  %v911_v32 = vadd.f32 %v1244_v30, %v757_v10  ;;  %v902_v33 = vpop.f32.mrb[21].mxu0  ;;  %v996_v30 = vpop.permute.xlu0 %995 }
 0x2fd   :  { %v981_v34 = vpack.c.bf16 %v966_v29, %v965_v28  ;;  %v903_v35 = vadd.f32 %v902_v33, %v747_v8  ;;  %v1245_v36 = vpop.f32.mrb[22].mxu0  ;;  %v1314_v29 = vld [vmem:[%s1672_s7] sm:$0xff]  }
 0x2fe   :  { %v955_v37 = vmul.f32 0.2, %v911_v32  ;;  %v914_v38 = vadd.f32 %v1245_v36, %v762_v14  ;;  %v905_v39 = vpop.f32.mrb[23].mxu0 }
 0x2ff   :  { %v953_v41 = vmul.f32 0.2, %v903_v35  ;;  %v906_v42 = vadd.f32 %v905_v39, %v752_v9  ;;  %1255 = vmatpush3.bf16.msra.mxu1 %v981_v34  ;;  %v1001_v34 = vpop.permute.xlu1 %1000 }
 0x300   :  { %v956_v43 = vmul.f32 0.2, %v914_v38  ;;  %1256 = vmatprep.subr.bf16.mxu1 %v1340_v3  ;;  %v971_v46 = vmax.f32 %v911_v32, %v955_v37 }
 0x301   :  { %v954_v45 = vmul.f32 0.2, %v906_v42  ;;  %v969_v48 = vmax.f32 %v903_v35, %v953_v41 }
 0x302   :  { %v972_v47 = vmax.f32 %v914_v38, %v956_v43 }
 0x303   :  { %v970_v49 = vmax.f32 %v906_v42, %v954_v45  ;;  %v1248_v50 = vpop.f32.mrb[24].mxu0  ;;  %1257 = vmatpush3.bf16.msra.mxu1 %v982_v31 }
 0x304   :  { %v984_v51 = vpack.c.bf16 %v972_v47, %v971_v46  ;;  %v927_v52 = vadd.f32 %v1248_v50, %v777_v40  ;;  %v918_v53 = vpop.f32.mrb[25].mxu0  ;;  %1258 = vmatprep.subr.bf16.mxu1 %v1340_v3 }
 0x305   :  { %v983_v55 = vpack.c.bf16 %v970_v49, %v969_v48  ;;  %v919_v56 = vadd.f32 %v918_v53, %v767_v23  ;;  %v1249_v57 = vpop.f32.mrb[26].mxu0 }
 0x306   :  { %v959_v58 = vmul.f32 0.2, %v927_v52  ;;  %v930_v59 = vadd.f32 %v1249_v57, %v782_v44  ;;  %v921_v60 = vpop.f32.mrb[27].mxu0 }
 0x307   :  { %v957_v62 = vmul.f32 0.2, %v919_v56  ;;  %v922_v63 = vadd.f32 %v921_v60, %v772_v27  ;;  %1259 = vmatpush3.bf16.msra.mxu1 %v983_v55 }
 0x308   :  { %v960_v0 = vmul.f32 0.2, %v930_v59  ;;  %1260 = vmatprep.subr.bf16.mxu1 %v1340_v3  ;;  %v975_v2 = vmax.f32 %v927_v52, %v959_v58 }
 0x309   :  { %v958_v1 = vmul.f32 0.2, %v922_v63  ;;  %v973_v6 = vmax.f32 %v919_v56, %v957_v62 }
 0x30a   :  { %v976_v4 = vmax.f32 %v930_v59, %v960_v0 }
 0x30b   :  { %v974_v7 = vmax.f32 %v922_v63, %v958_v1  ;;  %v1252_v8 = vpop.f32.mrb[28].mxu0  ;;  %1261 = vmatpush3.bf16.msra.mxu1 %v984_v51 }
 0x30c   :  { %v986_v9 = vpack.c.bf16 %v976_v4, %v975_v2  ;;  %v943_v10 = vadd.f32 %v1252_v8, %v797_v5  ;;  %v934_v11 = vpop.f32.mrb[29].mxu0  ;;  %1262 = vmatprep.subr.bf16.mxu1 %v1340_v3 }
 0x30d   :  { %v985_v13 = vpack.c.bf16 %v974_v7, %v973_v6  ;;  %v935_v14 = vadd.f32 %v934_v11, %v787_v54  ;;  %v1253_v15 = vpop.f32.mrb[30].mxu0 }
 0x30e   :  { %v963_v16 = vmul.f32 0.2, %v943_v10  ;;  %v946_v17 = vadd.f32 %v1253_v15, %v802_v12  ;;  %v937_v18 = vpop.f32.mrb[31].mxu0 }
 0x30f   :  { %v961_v19 = vmul.f32 0.2, %v935_v14  ;;  %v938_v20 = vadd.f32 %v937_v18, %v792_v61  ;;  %1263 = vmatpush3.bf16.msra.mxu1 %v985_v13 }
 0x310   :  { %v964_v21 = vmul.f32 0.2, %v946_v17  ;;  %1264 = vmatprep.subr.bf16.mxu1 %v1340_v3  ;;  %v979_v23 = vmax.f32 %v943_v10, %v963_v16 }
 0x311   :  { %v962_v22 = vmul.f32 0.2, %v938_v20  ;;  %v977_v25 = vmax.f32 %v935_v14, %v961_v19 }
 0x312   :  { %v980_v24 = vmax.f32 %v946_v17, %v964_v21 }
 0x313   :  { %v978_v26 = vmax.f32 %v938_v20, %v962_v22  ;;  %1265 = vmatpush3.bf16.msra.mxu1 %v986_v9 }
 0x314   :  { %v988_v27 = vpack.c.bf16 %v980_v24, %v979_v23  ;;  %1266 = vmatprep.subr.bf16.mxu1 %v1340_v3 }
 0x315   :  { %v987_v28 = vpack.c.bf16 %v978_v26, %v977_v25 }
 0x317   :  { %1267 = vmatpush3.bf16.msra.mxu1 %v987_v28 }
 0x318   :  { %1268 = vmatprep.subr.bf16.mxu1 %v1340_v3 }
 0x31b   :  { %1269 = vmatpush3.bf16.msra.mxu1 %v988_v27 }
 0x31e   :  { %1271 = vmatmul.mubr.bf16.vlgmr.msra.gmra.mrb[16].mxu1 %v1314_v29 }
 0x3f1   :  { %v1043_v31 = vpop.f32.mrb[16].mxu1 }
 0x3f2   :  { %v1044_v32 = vadd.f32 %v1043_v31, %v996_v30  ;;  %v1272_v33 = vpop.f32.mrb[17].mxu1 }
 0x3f3   :  { %v1046_v35 = vpop.f32.mrb[18].mxu1 }
 0x3f4   :  { %1050 = vst [vmem:[#allocation2] sm:$0xff] %v1044_v32  ;;  %v1047_v36 = vadd.f32 %v1046_v35, %v1001_v34  ;;  %v1273_v37 = vpop.f32.mrb[19].mxu1 }
 0x3f6   :  { %1051 = vst [vmem:[#allocation2 + $0x8] sm:$0xff] %v1047_v36 }
 0x3f7   :  { %1326 = shalt.err (!%p1323_p4)
}
 0x3f8   :  { %s1327_s10 = scalar_lea.hbm %s1674_s9, 256 }
 0x3f9   :  { %p1328_p5 = scmp.ne.s32.totalorder %s1674_s9, %s1327_s10  ;;  %p1331_p6 = scmp.lt.u32.totalorder %s1327_s10, %s1674_s9 }
 0x3fb   :  { %p1333_p7 = pnand %p1331_p6, %p1328_p5 }
 0x3fd   :  { %1336 = shalt.err (!%p1333_p7)
}
 0x3fe   :  { %s1343_s14 = smov 128   ;;  %s1344_s0 = smov 8  }
 0x3ff   :  { %1063 = dma.vmem_to_hbm [thread:$0]  %s1058_s28, 256, %s1674_s9, [#allocation3], %s1343_s14, %s1343_s14, %s1344_s0  }
 0x400   :  { %1337 = dma.done.wait [#allocation3], 256  }
 0x401   :  { %1338 = vsyncadd [#allocation3], 4294967040 }
 0x402   :  { %1067 = vsyncpa [#allocation3], 1 }

</bundles_post_ra>
